<compile_context>
chip_gen: v6e
topology: v6e:2x2x1
jax: 0.10.0
libtpu: 0.0.40
codegen_flags: <defaults>
</compile_context>

<pallas_src>
import functools

import jax
import jax.numpy as jnp
from jax.experimental import pallas as pl
from jax.experimental.pallas import tpu as pltpu

F_PAD = 128        # fourier feature dim (21 + bias column) padded to one lane width
CHANNELS = 512     # BetaMlp channels
NUM_FREQS = 10     # multires = 10  (out_dim = 1 + 10*2 = 21)
BIAS_COL = 21      # feats column that is constant 1.0 (carries b1 through fc1)
MAX_BM = 1024      # max batch tile (VMEM @ BM=1024: ~2MiB out x2 + ~2MiB h + <1MiB weights)
SMALL_B = 256      # below this, run a single grid step


def _round_up(x, m):
    return (x + m - 1) // m * m


def _cdiv(a, b):
    return (a + b - 1) // b


def _choose_tiling(B):
    """Returns (BM, B_pad, num_tiles)."""
    B8 = _round_up(max(B, 1), 8)
    if B8 <= SMALL_B:
        return B8, B8, 1                       # small batch: one step, no overhead
    nt = max(2, _cdiv(B8, MAX_BM))
    if nt % 2:
        nt += 1                                # even tile count -> both v7x TCs stay busy
    bm = _round_up(_cdiv(B8, nt), 8)
    return bm, bm * nt, nt


def _gc_kernel(beta_ref, const_ref, w1_ref, w2_ref, b2_ref, o_ref):
    beta = beta_ref[...]                       # [BM, 1] f32
    c = const_ref[...]                         # [8, F_PAD] packed constants
    freq = c[0:1, :]                           # per-column frequency (0 on id/bias/pad cols)
    off = c[1:2, :]                            # pi/2 on cos columns, 0 elsewhere
    idm = c[2:3, :]                            # 1.0 on column 0 only (identity / include_input)
    ones = c[3:4, :]                           # 1.0 on column BIAS_COL only (carries b1)

    # Fourier slab: col0=beta, cols1..20=sin/cos(beta*2^k), col21=1.0, rest=0.
    feats = idm * beta + ones + jnp.sin(beta * freq + off)   # [BM, F_PAD] f32

    # fc1 in f32 (b1 folded into W1 row BIAS_COL), ReLU.
    h = jnp.dot(feats, w1_ref[...], preferred_element_type=jnp.float32)
    h = jnp.maximum(h, 0.0)

    # fc2 with bf16 MXU operands, f32 accumulation, bias + ReLU in f32.
    o = jnp.dot(h.astype(jnp.bfloat16), w2_ref[...],
                preferred_element_type=jnp.float32)
    o_ref[...] = jnp.maximum(o + b2_ref[...], 0.0).astype(o_ref.dtype)


def _build_consts():
    """One [8, F_PAD] f32 slab: row0=freq, row1=phase offset, row2=id mask, row3=bias-ones mask."""
    freqs = 2.0 ** jnp.arange(NUM_FREQS, dtype=jnp.float32)   # log-sampled bands 2^0..2^9
    freq_row = jnp.zeros((F_PAD,), jnp.float32)
    off_row = jnp.zeros((F_PAD,), jnp.float32)
    id_row = jnp.zeros((F_PAD,), jnp.float32).at[0].set(1.0)
    ones_row = jnp.zeros((F_PAD,), jnp.float32).at[BIAS_COL].set(1.0)
    half_pi = jnp.float32(jnp.pi / 2.0)
    for k in range(NUM_FREQS):
        freq_row = freq_row.at[1 + 2 * k].set(freqs[k])       # sin column
        freq_row = freq_row.at[2 + 2 * k].set(freqs[k])       # cos column
        off_row = off_row.at[2 + 2 * k].set(half_pi)          # cos(x) = sin(x + pi/2)
    consts = jnp.zeros((8, F_PAD), jnp.float32)
    return (consts.at[0].set(freq_row).at[1].set(off_row)
                  .at[2].set(id_row).at[3].set(ones_row))


def prepare_params(w1, b1, w2, b2):
    """One-time weight prep (hoist out of the per-call hot path).

    w1: [21, 512], b1: [512], w2: [512, 512], b2: [512]  (features-last layout,
    i.e. PyTorch nn.Linear weights transposed). Returns (consts, w1p, w2_bf, b2_row).
    """
    consts = _build_consts()
    w1p = jnp.zeros((F_PAD, CHANNELS), jnp.float32)
    w1p = w1p.at[: w1.shape[0]].set(w1.astype(jnp.float32))
    w1p = w1p.at[BIAS_COL].set(b1.astype(jnp.float32))        # fold b1 into fc1 matmul
    w2_bf = w2.astype(jnp.bfloat16)
    b2_row = b2.reshape(1, CHANNELS).astype(jnp.float32)
    return consts, w1p, w2_bf, b2_row


def global_conditioning(beta, consts, w1p, w2_bf, b2_row, out_dtype=jnp.float32):
    """out = relu(relu(fourier(beta) @ W1 + b1) @ W2 + b2), shape [B, 512]."""
    B = beta.shape[0]
    BM, B_pad, num_tiles = _choose_tiling(B)

    beta_col = jnp.zeros((B_pad, 1), jnp.float32).at[:B, 0].set(beta.astype(jnp.float32))

    shared = lambda i: (0, 0)   # constant block index -> operand stays VMEM-resident

    out = pl.pallas_call(
        _gc_kernel,
        out_shape=jax.ShapeDtypeStruct((B_pad, CHANNELS), out_dtype),
        grid=(num_tiles,),
        in_specs=[
            pl.BlockSpec((BM, 1), lambda i: (i, 0)),           # beta tile (column)
            pl.BlockSpec((8, F_PAD), shared),                  # packed fourier constants
            pl.BlockSpec((F_PAD, CHANNELS), shared),           # W1 (padded, b1 folded, f32)
            pl.BlockSpec((CHANNELS, CHANNELS), shared),        # W2 (bf16)
            pl.BlockSpec((1, CHANNELS), shared),               # b2
        ],
        out_specs=pl.BlockSpec((BM, CHANNELS), lambda i: (i, 0)),
        compiler_params=pltpu.CompilerParams(
            dimension_semantics=("parallel",)),                # megacore-shardable on v7x
    )(beta_col, consts, w1p, w2_bf, b2_row)
    return out[:B]


def ref_forward(beta, w1, b1, w2, b2):
    """Pure-JAX f32 reference matching the PyTorch forward semantics."""
    freqs = 2.0 ** jnp.arange(NUM_FREQS, dtype=jnp.float32)
    cols = [beta[:, None]]
    for k in range(NUM_FREQS):
        cols.append(jnp.sin(beta * freqs[k])[:, None])
        cols.append(jnp.cos(beta * freqs[k])[:, None])
    feats = jnp.concatenate(cols, axis=1)                  # [B, 21]
    h = jnp.maximum(feats @ w1 + b1, 0.0)
    return jnp.maximum(h @ w2 + b2, 0.0)


if __name__ == "__main__":
    key = jax.random.PRNGKey(0)
    kb, k1, k2, k3, k4 = jax.random.split(key, 5)

    B = 16
    beta = jax.random.normal(kb, (B,), jnp.float32)

    # Deterministic PyTorch-Linear-style init (uniform +/- 1/sqrt(fan_in)).
    bound1 = 1.0 / (21.0 ** 0.5)
    w1 = jax.random.uniform(k1, (21, CHANNELS), jnp.float32, -bound1, bound1)
    b1 = jax.random.uniform(k2, (CHANNELS,), jnp.float32, -bound1, bound1)
    bound2 = 1.0 / (CHANNELS ** 0.5)
    w2 = jax.random.uniform(k3, (CHANNELS, CHANNELS), jnp.float32, -bound2, bound2)
    b2 = jax.random.uniform(k4, (CHANNELS,), jnp.float32, -bound2, bound2)

    # One-time weight prep, then the jitted hot path only streams beta / output.
    params = prepare_params(w1, b1, w2, b2)
    gc = jax.jit(functools.partial(global_conditioning, out_dtype=jnp.float32))

    out = gc(beta, *params)
    out = jax.block_until_ready(out)

    ref = ref_forward(beta, w1, b1, w2, b2)
    assert out.shape == (B, CHANNELS)
    err = float(jnp.max(jnp.abs(out - ref)))
    assert jnp.allclose(out, ref, rtol=2e-2, atol=2e-2), f"max abs err {err}"
    print("KERNEL_OK")
</pallas_src>

<mosaic_0001>
module attributes {stable_mosaic.version = 11 : i64} {
  func.func @_gc_kernel(%arg0: i32, %arg1: memref<16x1xf32, #tpu.memory_space<vmem>>, %arg2: memref<8x128xf32, #tpu.memory_space<vmem>>, %arg3: memref<128x512xf32, #tpu.memory_space<vmem>>, %arg4: memref<512x512xbf16, #tpu.memory_space<vmem>>, %arg5: memref<1x512xf32, #tpu.memory_space<vmem>>, %arg6: memref<16x512xf32, #tpu.memory_space<vmem>>) attributes {dimension_semantics = [#tpu.dimension_semantics<parallel>], iteration_bounds = array<i64: 1>, scalar_prefetch = 0 : i64, scratch_operands = 0 : i64, tpu.core_type = #tpu.core_type<tc>, window_params = [{transform_indices = @transform_0, window_bounds = array<i64: 16, 1>}, {pipeline_mode = #tpu.pipeline_mode<synchronous>, transform_indices = @transform_1, window_bounds = array<i64: 8, 128>}, {pipeline_mode = #tpu.pipeline_mode<synchronous>, transform_indices = @transform_2, window_bounds = array<i64: 128, 512>}, {pipeline_mode = #tpu.pipeline_mode<synchronous>, transform_indices = @transform_3, window_bounds = array<i64: 512, 512>}, {pipeline_mode = #tpu.pipeline_mode<synchronous>, transform_indices = @transform_4, window_bounds = array<i64: 1, 512>}, {transform_indices = @transform_5, window_bounds = array<i64: 16, 512>}]} {
    %c0 = arith.constant 0 : index
    %c0_0 = arith.constant 0 : index
    %0 = vector.load %arg1[%c0, %c0_0] : memref<16x1xf32, #tpu.memory_space<vmem>>, vector<16x1xf32>
    %c0_1 = arith.constant 0 : index
    %c0_2 = arith.constant 0 : index
    %1 = vector.load %arg2[%c0_1, %c0_2] : memref<8x128xf32, #tpu.memory_space<vmem>>, vector<8x128xf32>
    %2 = vector.extract_strided_slice %1 {offsets = [0, 0], sizes = [1, 128], strides = [1, 1]} : vector<8x128xf32> to vector<1x128xf32>
    %3 = vector.extract_strided_slice %1 {offsets = [1, 0], sizes = [1, 128], strides = [1, 1]} : vector<8x128xf32> to vector<1x128xf32>
    %4 = vector.extract_strided_slice %1 {offsets = [2, 0], sizes = [1, 128], strides = [1, 1]} : vector<8x128xf32> to vector<1x128xf32>
    %5 = vector.extract_strided_slice %1 {offsets = [3, 0], sizes = [1, 128], strides = [1, 1]} : vector<8x128xf32> to vector<1x128xf32>
    %6 = vector.broadcast %4 : vector<1x128xf32> to vector<16x128xf32>
    %7 = vector.broadcast %0 : vector<16x1xf32> to vector<16x128xf32>
    %8 = arith.mulf %6, %7 : vector<16x128xf32>
    %9 = vector.broadcast %5 : vector<1x128xf32> to vector<16x128xf32>
    %10 = arith.addf %8, %9 : vector<16x128xf32>
    %11 = vector.broadcast %0 : vector<16x1xf32> to vector<16x128xf32>
    %12 = vector.broadcast %2 : vector<1x128xf32> to vector<16x128xf32>
    %13 = arith.mulf %11, %12 : vector<16x128xf32>
    %14 = vector.broadcast %3 : vector<1x128xf32> to vector<16x128xf32>
    %15 = arith.addf %13, %14 : vector<16x128xf32>
    %16 = math.sin %15 : vector<16x128xf32>
    %17 = arith.addf %10, %16 : vector<16x128xf32>
    %c0_3 = arith.constant 0 : index
    %c0_4 = arith.constant 0 : index
    %18 = vector.load %arg3[%c0_3, %c0_4] : memref<128x512xf32, #tpu.memory_space<vmem>>, vector<128x512xf32>
    %cst = arith.constant dense<0.000000e+00> : vector<16x512xf32>
    %19 = tpu.matmul %17, %18, %cst {dimension_numbers = #tpu.dot_dimension_numbers<[1], [0], [0], [1], [0, 0, 1, 1], [], []>} : vector<16x128xf32>, vector<128x512xf32>, vector<16x512xf32> -> vector<16x512xf32>
    %cst_5 = arith.constant 0.000000e+00 : f32
    %20 = vector.broadcast %cst_5 : f32 to vector<16x512xf32>
    %21 = arith.maximumf %19, %20 : vector<16x512xf32>
    %22 = arith.truncf %21 : vector<16x512xf32> to vector<16x512xbf16>
    %c0_6 = arith.constant 0 : index
    %c0_7 = arith.constant 0 : index
    %23 = vector.load %arg4[%c0_6, %c0_7] : memref<512x512xbf16, #tpu.memory_space<vmem>>, vector<512x512xbf16>
    %cst_8 = arith.constant dense<0.000000e+00> : vector<16x512xf32>
    %24 = tpu.matmul %22, %23, %cst_8 {dimension_numbers = #tpu.dot_dimension_numbers<[1], [0], [0], [1], [0, 0, 1, 1], [], []>} : vector<16x512xbf16>, vector<512x512xbf16>, vector<16x512xf32> -> vector<16x512xf32>
    %c0_9 = arith.constant 0 : index
    %c0_10 = arith.constant 0 : index
    %25 = vector.load %arg5[%c0_9, %c0_10] : memref<1x512xf32, #tpu.memory_space<vmem>>, vector<1x512xf32>
    %26 = vector.broadcast %25 : vector<1x512xf32> to vector<16x512xf32>
    %27 = arith.addf %24, %26 : vector<16x512xf32>
    %cst_11 = arith.constant 0.000000e+00 : f32
    %28 = vector.broadcast %cst_11 : f32 to vector<16x512xf32>
    %29 = arith.maximumf %27, %28 : vector<16x512xf32>
    %c0_12 = arith.constant 0 : index
    %c0_13 = arith.constant 0 : index
    %30 = vector.load %arg6[%c0_12, %c0_13] : memref<16x512xf32, #tpu.memory_space<vmem>>, vector<16x512xf32>
    tpu.vector_store %arg6[%c0_12, %c0_13], %29 {strides = array<i32>} : memref<16x512xf32, #tpu.memory_space<vmem>>, vector<16x512xf32>,
    return
  }
  func.func @transform_0(%arg0: i32) -> (i32, i32) {
    %c0_i32 = arith.constant 0 : i32
    %c0_i32_0 = arith.constant 0 : i32
    return %arg0, %c0_i32 : i32, i32
  }
  func.func @transform_1(%arg0: i32) -> (i32, i32) {
    %c0_i32 = arith.constant 0 : i32
    %c0_i32_0 = arith.constant 0 : i32
    %c0_i32_1 = arith.constant 0 : i32
    return %c0_i32, %c0_i32_0 : i32, i32
  }
  func.func @transform_2(%arg0: i32) -> (i32, i32) {
    %c0_i32 = arith.constant 0 : i32
    %c0_i32_0 = arith.constant 0 : i32
    %c0_i32_1 = arith.constant 0 : i32
    return %c0_i32, %c0_i32_0 : i32, i32
  }
  func.func @transform_3(%arg0: i32) -> (i32, i32) {
    %c0_i32 = arith.constant 0 : i32
    %c0_i32_0 = arith.constant 0 : i32
    %c0_i32_1 = arith.constant 0 : i32
    return %c0_i32, %c0_i32_0 : i32, i32
  }
  func.func @transform_4(%arg0: i32) -> (i32, i32) {
    %c0_i32 = arith.constant 0 : i32
    %c0_i32_0 = arith.constant 0 : i32
    %c0_i32_1 = arith.constant 0 : i32
    return %c0_i32, %c0_i32_0 : i32, i32
  }
  func.func @transform_5(%arg0: i32) -> (i32, i32) {
    %c0_i32 = arith.constant 0 : i32
    %c0_i32_0 = arith.constant 0 : i32
    return %arg0, %c0_i32 : i32, i32
  }
}

</mosaic_0001>

<bundles_post_ra>
// kernel: global_conditioning.1
= control target key start
LH: loop header
LB: loop body
LE: loop exit
PB: predicated region body
PF: predicated region fallthrough
CT: control target
= control target key end

     0   :  { %10 = vsyncpa [#allocation3], 0  ;;  %s2128_s0 = inlined_call_operand.vmem [shape: f32[16,1], index: 0, kind: input, shape index: {}]   ;;  %s2129_s1 = inlined_call_operand.vmem [shape: f32[8,128], index: 1, kind: input, shape index: {}]   ;;  %s2130_s2 = inlined_call_operand.hbm [shape: f32[128,512], index: 2, kind: input, shape index: {}]   ;;  %s2131_s3 = inlined_call_operand.hbm [shape: bf16[512,512], index: 3, kind: input, shape index: {}]   ;;  %s2132_s4 = inlined_call_operand.vmem [shape: f32[1,512], index: 4, kind: input, shape index: {}]   ;;  %s2133_s5 = inlined_call_operand.hbm [shape: f32[16,512], index: 5, kind: output, shape index: {}]  }
   0x1   :  { %11 = vsyncpa [#allocation6], 0 }
   0x2   :  { %12 = vsyncpa [#allocation4], 0  ;;  %s1948_s18 = smov [#allocation2]  }
   0x3   :  { %s22_s19 = sshll.u32 %s1948_s18, 4  ;;  %s23_s19 = int_to_ptr.vmem [resolvable:$true] %s22_s19 }
   0x4   :  { %s1890_s20 = scalar_lea.vmem %s23_s19, 8192  ;;  %p1895_p1 = scmp.lt.s32.totalorder %s23_s19, %s23_s19 }
   0x5   :  { %p1891_p0 = scmp.ne.s32.totalorder %s23_s19, %s1890_s20  ;;  %p1896_p2 = scmp.lt.s32.totalorder %s1890_s20, %s1890_s20 }
   0x7   :  { %p1897_p3 = por %p1896_p2, %p1895_p1 }
   0x9   :  { %p1898_p4 = pnand %p1897_p3, %p1891_p0 }
   0xb   :  { %1901 = shalt.err (!%p1898_p4)
}
   0xc   :  { %s1949_s21 = smov 512   ;;  %s1950_s22 = smov 32  }
   0xd   :  { %28 = dma.hbm_to_vmem [thread:$0]  %s2130_s2, 8192, %s23_s19, [#allocation3], %s1949_s21, %s1949_s21, %s1950_s22  }
   0xe   :  { %s1951_s25 = smov [#allocation5]  }
   0xf   :  { %s34_s26 = sshll.u32 %s1951_s25, 4  ;;  %s35_s26 = int_to_ptr.vmem [resolvable:$true] %s34_s26 }
  0x10   :  { %s1910_s27 = scalar_lea.vmem %s35_s26, 16384  ;;  %p1915_p6 = scmp.lt.s32.totalorder %s35_s26, %s35_s26 }
  0x11   :  { %p1911_p5 = scmp.ne.s32.totalorder %s35_s26, %s1910_s27  ;;  %p1916_p7 = scmp.lt.s32.totalorder %s1910_s27, %s1910_s27 }
  0x13   :  { %p1917_p8 = por %p1916_p7, %p1915_p6 }
  0x15   :  { %p1918_p9 = pnand %p1917_p8, %p1911_p5 }
  0x17   :  { %1921 = shalt.err (!%p1918_p9)
}
  0x18   :  { %s1952_s28 = smov 256   ;;  %s1953_s29 = smov 16  }
  0x19   :  { %40 = dma.hbm_to_vmem [thread:$0]  %s2131_s3, 16384, %s35_s26, [#allocation6], %s1952_s28, %s1952_s28, %s1953_s29  }
  0x1a   :  { %1942 = dma.done.wait [#allocation3], 8192  }
  0x1b   :  { %1943 = vsyncadd [#allocation3], 4294959104 }
  0x1c   :  { %1944 = dma.done.wait [#allocation6], 16384  }
  0x1d   :  { %1945 = vsyncadd [#allocation6], 4294950912  ;;  %v1954_v0 = vmov 0   ;;  %v49_v1 = vld [vmem:[%s2128_s0] sm:$0xff]  ;;  %v50_v2 = vld [vmem:[%s2128_s0 + $0x8] sm:$0xff] }
  0x1e   :  { %1681 = vset.pattern.permute.xlu0 %v1954_v0  ;;  %v357_v3 = vld [vmem:[#allocation2 + $0x1e8] sm:$0xff]  ;;  %v359_v4 = vld [vmem:[#allocation2 + $0x1f8] sm:$0xff]  ;;  %v356_v5 = vld [vmem:[#allocation2 + $0x1e0] sm:$0xff] }
  0x1f   :  { %58 = vperm.xlu0 %1681, %v49_v1   ;;  %360 = vmatprep.subr.mxu0 %v357_v3  ;;  %v358_v6 = vld [vmem:[#allocation2 + $0x1f0] sm:$0xff]  ;;  %v353_v7 = vld [vmem:[#allocation2 + $0x1c8] sm:$0xff]  ;;  %v355_v8 = vld [vmem:[#allocation2 + $0x1d8] sm:$0xff]  ;;  %v1955_v3 = vmov 0.0  }
  0x20   :  { %437 = vmatprep.subr.mxu1 %v359_v4  ;;  %361 = vmatpush1.msra.mxu0 %v356_v5  ;;  %v352_v9 = vld [vmem:[#allocation2 + $0x1c0] sm:$0xff]  ;;  %v354_v10 = vld [vmem:[#allocation2 + $0x1d0] sm:$0xff]  ;;  %v349_v11 = vld [vmem:[#allocation2 + $0x1a8] sm:$0xff] }
  0x21   :  { %438 = vmatpush1.msra.mxu1 %v358_v6  ;;  %362 = vmatprep.subr.mxu0 %v353_v7  ;;  %v351_v12 = vld [vmem:[#allocation2 + $0x1b8] sm:$0xff]  ;;  %v348_v13 = vld [vmem:[#allocation2 + $0x1a0] sm:$0xff]  ;;  %v350_v14 = vld [vmem:[#allocation2 + $0x1b0] sm:$0xff]  ;;  %v52_v6 = vlaneseq }
  0x22   :  { %439 = vmatprep.subr.mxu1 %v355_v8  ;;  %363 = vmatpush1.msra.mxu0 %v352_v9  ;;  %v345_v15 = vld [vmem:[#allocation2 + $0x188] sm:$0xff]  ;;  %v347_v16 = vld [vmem:[#allocation2 + $0x198] sm:$0xff]  ;;  %v344_v17 = vld [vmem:[#allocation2 + $0x180] sm:$0xff] }
  0x23   :  { %63 = vperm.xlu0 %1681, %v50_v2   ;;  %440 = vmatpush1.msra.mxu1 %v354_v10  ;;  %v346_v18 = vld [vmem:[#allocation2 + $0x190] sm:$0xff]  ;;  %v341_v19 = vld [vmem:[#allocation2 + $0x168] sm:$0xff]  ;;  %v343_v20 = vld [vmem:[#allocation2 + $0x178] sm:$0xff]  ;;  %v2010_v7 = vshrl.u32 %v52_v6, 7 }
  0x24   :  { %364 = vmatprep.subr.mxu0 %v349_v11  ;;  %441 = vmatprep.subr.mxu1 %v351_v12  ;;  %v340_v21 = vld [vmem:[#allocation2 + $0x160] sm:$0xff]  ;;  %v342_v22 = vld [vmem:[#allocation2 + $0x170] sm:$0xff]  ;;  %v337_v23 = vld [vmem:[#allocation2 + $0x148] sm:$0xff] }
  0x25   :  { %365 = vmatpush1.msra.mxu0 %v348_v13  ;;  %442 = vmatpush1.msra.mxu1 %v350_v14  ;;  %v339_v24 = vld [vmem:[#allocation2 + $0x158] sm:$0xff]  ;;  %v336_v25 = vld [vmem:[#allocation2 + $0x140] sm:$0xff]  ;;  %v338_v26 = vld [vmem:[#allocation2 + $0x150] sm:$0xff]  ;;  %v54_v8 = vsub.s32 2, %v2010_v7  ;;  %v76_v9 = vsub.s32 0, %v2010_v7  ;;  %v70_v11 = vsub.s32 3, %v2010_v7 }
  0x26   :  { %366 = vmatprep.subr.mxu0 %v345_v15  ;;  %443 = vmatprep.subr.mxu1 %v347_v16  ;;  %v333_v27 = vld [vmem:[#allocation2 + $0x128] sm:$0xff]  ;;  %v335_v28 = vld [vmem:[#allocation2 + $0x138] sm:$0xff]  ;;  %v332_v29 = vld [vmem:[#allocation2 + $0x120] sm:$0xff]  ;;  %v82_v12 = vsub.s32 1, %v2010_v7 }
  0x27   :  { %367 = vmatpush1.msra.mxu0 %v344_v17  ;;  %444 = vmatpush1.msra.mxu1 %v346_v18  ;;  %v334_v30 = vld [vmem:[#allocation2 + $0x130] sm:$0xff]  ;;  %v329_v31 = vld [vmem:[#allocation2 + $0x108] sm:$0xff]  ;;  %v331_v32 = vld [vmem:[#allocation2 + $0x118] sm:$0xff] }
  0x28   :  { %368 = vmatprep.subr.mxu0 %v341_v19  ;;  %445 = vmatprep.subr.mxu1 %v343_v20  ;;  %v328_v33 = vld [vmem:[#allocation2 + $0x100] sm:$0xff]  ;;  %v330_v34 = vld [vmem:[#allocation2 + $0x110] sm:$0xff]  ;;  %v325_v35 = vld [vmem:[#allocation2 + $0xe8] sm:$0xff] }
  0x29   :  { %369 = vmatpush1.msra.mxu0 %v340_v21  ;;  %446 = vmatpush1.msra.mxu1 %v342_v22  ;;  %v327_v36 = vld [vmem:[#allocation2 + $0xf8] sm:$0xff]  ;;  %v324_v37 = vld [vmem:[#allocation2 + $0xe0] sm:$0xff]  ;;  %v326_v38 = vld [vmem:[#allocation2 + $0xf0] sm:$0xff] }
  0x2a   :  { %370 = vmatprep.subr.mxu0 %v337_v23  ;;  %447 = vmatprep.subr.mxu1 %v339_v24  ;;  %v321_v39 = vld [vmem:[#allocation2 + $0xc8] sm:$0xff]  ;;  %v323_v40 = vld [vmem:[#allocation2 + $0xd8] sm:$0xff]  ;;  %v320_v41 = vld [vmem:[#allocation2 + $0xc0] sm:$0xff] }
  0x2b   :  { %371 = vmatpush1.msra.mxu0 %v336_v25  ;;  %448 = vmatpush1.msra.mxu1 %v338_v26  ;;  %v322_v42 = vld [vmem:[#allocation2 + $0xd0] sm:$0xff]  ;;  %v317_v43 = vld [vmem:[#allocation2 + $0xa8] sm:$0xff]  ;;  %v319_v44 = vld [vmem:[#allocation2 + $0xb8] sm:$0xff] }
  0x2c   :  { %372 = vmatprep.subr.mxu0 %v333_v27  ;;  %449 = vmatprep.subr.mxu1 %v335_v28  ;;  %v316_v45 = vld [vmem:[#allocation2 + $0xa0] sm:$0xff]  ;;  %v318_v46 = vld [vmem:[#allocation2 + $0xb0] sm:$0xff]  ;;  %v313_v47 = vld [vmem:[#allocation2 + $0x88] sm:$0xff] }
  0x2d   :  { %373 = vmatpush1.msra.mxu0 %v332_v29  ;;  %450 = vmatpush1.msra.mxu1 %v334_v30  ;;  %v315_v48 = vld [vmem:[#allocation2 + $0x98] sm:$0xff]  ;;  %v312_v49 = vld [vmem:[#allocation2 + $0x80] sm:$0xff]  ;;  %v314_v50 = vld [vmem:[#allocation2 + $0x90] sm:$0xff] }
  0x2e   :  { %374 = vmatprep.subr.mxu0 %v329_v31  ;;  %451 = vmatprep.subr.mxu1 %v331_v32  ;;  %v309_v51 = vld [vmem:[#allocation2 + $0x68] sm:$0xff]  ;;  %v311_v52 = vld [vmem:[#allocation2 + $0x78] sm:$0xff]  ;;  %v308_v53 = vld [vmem:[#allocation2 + $0x60] sm:$0xff] }
  0x2f   :  { %375 = vmatpush1.msra.mxu0 %v328_v33  ;;  %452 = vmatpush1.msra.mxu1 %v330_v34  ;;  %v310_v54 = vld [vmem:[#allocation2 + $0x70] sm:$0xff]  ;;  %v305_v55 = vld [vmem:[#allocation2 + $0x48] sm:$0xff]  ;;  %v307_v56 = vld [vmem:[#allocation2 + $0x58] sm:$0xff] }
  0x30   :  { %376 = vmatprep.subr.mxu0 %v325_v35  ;;  %453 = vmatprep.subr.mxu1 %v327_v36  ;;  %v304_v57 = vld [vmem:[#allocation2 + $0x40] sm:$0xff]  ;;  %v306_v58 = vld [vmem:[#allocation2 + $0x50] sm:$0xff]  ;;  %v301_v59 = vld [vmem:[#allocation2 + $0x28] sm:$0xff] }
  0x31   :  { %377 = vmatpush1.msra.mxu0 %v324_v37  ;;  %454 = vmatpush1.msra.mxu1 %v326_v38  ;;  %v303_v60 = vld [vmem:[#allocation2 + $0x38] sm:$0xff]  ;;  %v300_v61 = vld [vmem:[#allocation2 + $0x20] sm:$0xff]  ;;  %v302_v62 = vld [vmem:[#allocation2 + $0x30] sm:$0xff] }
  0x32   :  { %378 = vmatprep.subr.mxu0 %v321_v39  ;;  %455 = vmatprep.subr.mxu1 %v323_v40  ;;  %v297_v63 = vld [vmem:[#allocation2 + $0x8] sm:$0xff]  ;;  %v299_v0 = vld [vmem:[#allocation2 + $0x18] sm:$0xff]  ;;  %v296_v1 = vld [vmem:[#allocation2] sm:$0xff] }
  0x33   :  { %379 = vmatpush1.msra.mxu0 %v320_v41  ;;  %456 = vmatpush1.msra.mxu1 %v322_v42  ;;  %v298_v2 = vld [vmem:[#allocation2 + $0x10] sm:$0xff]  ;;  %v51_v10 = vld [vmem:[%s2129_s1] sm:$0xff] }
  0x34   :  { %380 = vmatprep.subr.mxu0 %v317_v43  ;;  %457 = vmatprep.subr.mxu1 %v319_v44  ;;  %v1684_v4 = vld [vmem:[#allocation5 + $0xe4] ss:$16 sps:$4 sm:$0xff]   ;;  %v55_v13 = vrot.slane %v51_v10, %v54_v8  ;;  %v77_v14 = vrot.slane %v51_v10, %v76_v9  ;;  %v71_v15 = vrot.slane %v51_v10, %v70_v11  ;;  %v1956_v43 = vmov 683565275  }
  0x35   :  { %381 = vmatpush1.msra.mxu0 %v316_v45  ;;  %458 = vmatpush1.msra.mxu1 %v318_v46  ;;  %v1687_v5 = vld [vmem:[#allocation5 + $0x2e4] ss:$16 sps:$4 sm:$0xff]   ;;  %v83_v16 = vrot.slane %v51_v10, %v82_v12 }
  0x36   :  { %382 = vmatprep.subr.mxu0 %v313_v47  ;;  %459 = vmatprep.subr.mxu1 %v315_v48  ;;  %v1957_v47 = vmov 2475754826  }
  0x37   :  { %383 = vmatpush1.msra.mxu0 %v312_v49  ;;  %460 = vmatpush1.msra.mxu1 %v314_v50  ;;  %v1958_v49 = vmov 2131351028  }
  0x38   :  { %384 = vmatprep.subr.mxu0 %v309_v51  ;;  %461 = vmatprep.subr.mxu1 %v311_v52  ;;  %v1959_v51 = vmov 2102212464  }
  0x39   :  { %385 = vmatpush1.msra.mxu0 %v308_v53  ;;  %462 = vmatpush1.msra.mxu1 %v310_v54  ;;  %v1960_v53 = vmov 920167782  }
  0x3a   :  { %386 = vmatprep.subr.mxu0 %v305_v55  ;;  %463 = vmatprep.subr.mxu1 %v307_v56 }
  0x3b   :  { %387 = vmatpush1.msra.mxu0 %v304_v57  ;;  %464 = vmatpush1.msra.mxu1 %v306_v58 }
  0x3c   :  { %388 = vmatprep.subr.mxu0 %v301_v59  ;;  %465 = vmatprep.subr.mxu1 %v303_v60  ;;  %v1961_v60 = vmov 1326507024  }
  0x3d   :  { %389 = vmatpush1.msra.mxu0 %v300_v61  ;;  %466 = vmatpush1.msra.mxu1 %v302_v62 }
  0x3e   :  { %390 = vmatprep.subr.mxu0 %v297_v63  ;;  %467 = vmatprep.subr.mxu1 %v299_v0 }
  0x3f   :  { %391 = vmatpush1.msra.mxu0 %v296_v1  ;;  %424 = vmatprep.mubr.f32.mxu0 %v1955_v3 }
  0x40   :  { %468 = vmatpush1.msra.mxu1 %v298_v2  ;;  %501 = vmatprep.mubr.f32.mxu1 %v1955_v3 }
  0x41   :  { %1316 = vmatprep.subr.bf16.mxu0 %v1684_v4  ;;  %1359 = vmatprep.subr.bf16.mxu1 %v1687_v5 }
  0x9a   :  { %v59_v17 = vpop.permute.xlu0 %58 }
  0x9b   :  { %v66_v18 = vmul.f32 %v59_v17, %v55_v13  ;;  %v78_v19 = vmul.f32 %v77_v14, %v59_v17 }
  0x9d   :  { %v2027_v20 = vadd.f32 %v71_v15, %v66_v18  ;;  %v2029_v21 = vadd.f32 %v83_v16, %v78_v19 }
  0x9e   :  { %v64_v22 = vpop.permute.xlu0 %63 }
  0x9f   :  { %v86_v23 = vand.u32 2147483647, %v2029_v21  ;;  %v89_v24 = vand.u32 2139095040, %v2029_v21  ;;  %v67_v25 = vmul.f32 %v64_v22, %v55_v13  ;;  %v79_v26 = vmul.f32 %v77_v14, %v64_v22 }
  0xa0   :  { %vm88_vm14 = vcmp.lt.s32.totalorder %v2029_v21, 0 }
  0xa1   :  { %v90_v27 = vshrl.u32 %v89_v24, 23  ;;  %v2033_v28 = vadd.f32 %v71_v15, %v67_v25  ;;  %v93_v29 = vand.u32 8388607, %v86_v23  ;;  %v2037_v30 = vadd.f32 %v83_v16, %v79_v26 }
  0xa2   :  { %vm87_vm15 = vcmp.le.f32.partialorder %v86_v23, 0.7853982  ;;  %v1738_v23 = vld [vmem:[#allocation5 + $0x1c4] ss:$16 sps:$4 sm:$0xff]  }
  0xa3   :  { %v1522_v31 = vadd.s32 4294967169, %v90_v27  ;;  %v193_v32 = vand.u32 2139095040, %v2037_v30  ;;  %v94_v34 = vor.u32 8388608, %v93_v29  ;;  %v190_v36 = vand.u32 2147483647, %v2037_v30 }
  0xa5   :  { %v96_v33 = vadd.s32 1, %v1522_v31  ;;  %v194_v35 = vshrl.u32 %v193_v32, 23  ;;  %v2041_v41 = vshll.u32 %v94_v34, 8  ;;  %v197_v45 = vand.u32 8388607, %v190_v36 }
  0xa7   :  { %vm97_vm0 = vcmp.gt.s32.totalorder %v96_v33, 0  ;;  %v1526_v38 = vadd.s32 4294967169, %v194_v35  ;;  %v198_v17 = vor.u32 8388608, %v197_v45 }
  0xa8   :  { %v98_v37 = vsel %vm97_vm0, %v96_v33, 0  ;;  %vm192_vm0 = vcmp.lt.s32.totalorder %v2037_v30, 0 }
  0xa9   :  { %v99_v39 = vshrl.u32 %v98_v37, 5  ;;  %v100_v40 = vand.u32 31, %v98_v37  ;;  %v200_v46 = vadd.s32 1, %v1526_v38  ;;  %v238_v35 = vshll.u32 %v198_v17, 8 }
  0xab   :  { %v101_v42 = vsub.s32 32, %v100_v40  ;;  %v103_v44 = vshll.u32 %v1956_v43, %v100_v40  ;;  %v106_v48 = vshll.u32 %v1957_v47, %v100_v40  ;;  %v109_v50 = vshll.u32 %v1958_v49, %v100_v40 }
  0xac   :  { %v112_v52 = vshll.u32 %v1959_v51, %v100_v40  ;;  %v115_v54 = vshll.u32 %v1960_v53, %v100_v40  ;;  %vm118_vm1 = vcmp.lt.s32.totalorder %v99_v39, 1  ;;  %vm120_vm2 = vcmp.lt.s32.totalorder %v99_v39, 3 }
  0xad   :  { %v104_v55 = vshrl.u32 %v1957_v47, %v101_v42  ;;  %v107_v56 = vshrl.u32 %v1958_v49, %v101_v42  ;;  %v110_v57 = vshrl.u32 %v1959_v51, %v101_v42  ;;  %v102_v58 = vshrl.u32 %v1956_v43, %v101_v42 }
  0xae   :  { %v113_v59 = vshrl.u32 %v1960_v53, %v101_v42  ;;  %v116_v61 = vshrl.u32 %v1961_v60, %v101_v42  ;;  %vm201_vm3 = vcmp.gt.s32.totalorder %v200_v46, 0  ;;  %vm121_vm4 = vcmp.lt.s32.totalorder %v99_v39, 4 }
  0xaf   :  { %v105_v62 = vor.u32 %v104_v55, %v103_v44  ;;  %v108_v63 = vor.u32 %v107_v56, %v106_v48  ;;  %v111_v0 = vor.u32 %v110_v57, %v109_v50  ;;  %v202_v4 = vsel %vm201_vm3, %v200_v46, 0 }
  0xb0   :  { %v114_v1 = vor.u32 %v113_v59, %v112_v52  ;;  %v117_v2 = vor.u32 %v116_v61, %v115_v54  ;;  %vm119_vm5 = vcmp.lt.s32.totalorder %v99_v39, 2  ;;  %v204_v22 = vand.u32 31, %v202_v4 }
  0xb1   :  { %v122_v5 = vsel %vm118_vm1, %v102_v58, %v105_v62  ;;  %v123_v6 = vsel %vm121_vm4, %v111_v0, 2102212464  ;;  %v126_v10 = vsel %vm118_vm1, %v105_v62, %v108_v63  ;;  %v130_v13 = vsel %vm118_vm1, %v108_v63, %v111_v0 }
  0xb2   :  { %v124_v14 = vsel %vm120_vm2, %v108_v63, %v123_v6  ;;  %v127_v15 = vsel %vm121_vm4, %v114_v1, 920167782  ;;  %v131_v16 = vsel %vm121_vm4, %v117_v2, 1326507024  ;;  %v203_v33 = vshrl.u32 %v202_v4, 5 }
  0xb3   :  { %v128_v18 = vsel %vm120_vm2, %v111_v0, %v127_v15  ;;  %v132_v19 = vsel %vm120_vm2, %v114_v1, %v131_v16  ;;  %v125_v24 = vsel %vm119_vm5, %v122_v5, %v124_v14  ;;  %v205_v34 = vsub.s32 32, %v204_v22 }
  0xb4   :  { %v129_v25 = vsel %vm119_vm5, %v126_v10, %v128_v18  ;;  %v133_v26 = vsel %vm119_vm5, %v130_v13, %v132_v19  ;;  %v141_v37 = vmul.u32 %v2041_v41, %v125_v24  ;;  %v207_v38 = vshll.u32 %v1956_v43, %v204_v22 }
  0xb5   :  { %v2054_v27 = vmul.u32.u64.low %v2041_v41, %v133_v26  ;;  %v2055_v29 = vmul.u32.u64.high %v2041_v41, %v133_v26, %v2054_v27  ;;  %v2058_v31 = vmul.u32.u64.low %v2041_v41, %v129_v25  ;;  %v2059_v32 = vmul.u32.u64.high %v2041_v41, %v129_v25, %v2058_v31 }
  0xb6   :  { %v210_v39 = vshll.u32 %v1957_v47, %v204_v22  ;;  %v213_v40 = vshll.u32 %v1958_v49, %v204_v22  ;;  %v208_v42 = vshrl.u32 %v1957_v47, %v205_v34  ;;  %v211_v44 = vshrl.u32 %v1958_v49, %v205_v34 }
  0xb7   :  { %v214_v45 = vshrl.u32 %v1959_v51, %v205_v34  ;;  %v216_v46 = vshll.u32 %v1959_v51, %v204_v22  ;;  %vm143_vm6 = vc.u32 %v2055_v29, %v2058_v31  ;;  %v144_v48 = vadd.s32 1, %v2059_v32 }
  0xb8   :  { %v217_v50 = vshrl.u32 %v1960_v53, %v205_v34  ;;  %v219_v52 = vshll.u32 %v1960_v53, %v204_v22  ;;  %v209_v54 = vor.u32 %v208_v42, %v207_v38  ;;  %v212_v55 = vor.u32 %v211_v44, %v210_v39 }
  0xb9   :  { %v215_v56 = vor.u32 %v214_v45, %v213_v40  ;;  %v220_v57 = vshrl.u32 %v1961_v60, %v205_v34  ;;  %v145_v41 = vsel %vm143_vm6, %v144_v48, %v2059_v32  ;;  %vm222_vm7 = vcmp.lt.s32.totalorder %v203_v33, 1 }
  0xba   :  { %v218_v58 = vor.u32 %v217_v50, %v216_v46  ;;  %vm225_vm8 = vcmp.lt.s32.totalorder %v203_v33, 4  ;;  %v146_v47 = vadd.s32 %v145_v41, %v141_v37  ;;  %vm224_vm9 = vcmp.lt.s32.totalorder %v203_v33, 3 }
  0xbb   :  { %v221_v49 = vor.u32 %v220_v57, %v219_v52  ;;  %v227_v51 = vsel %vm225_vm8, %v215_v56, 2102212464  ;;  %v206_v59 = vshrl.u32 %v1956_v43, %v205_v34  ;;  %v230_v61 = vsel %vm222_vm7, %v209_v54, %v212_v55 }
  0xbc   :  { %v231_v62 = vsel %vm225_vm8, %v218_v58, 920167782  ;;  %v234_v63 = vsel %vm222_vm7, %v212_v55, %v215_v56  ;;  %v147_v0 = vadd.s32 536870912, %v146_v47  ;;  %vm223_vm10 = vcmp.lt.s32.totalorder %v203_v33, 2 }
  0xbd   :  { %v232_v53 = vsel %vm224_vm9, %v215_v56, %v231_v62  ;;  %v235_v1 = vsel %vm225_vm8, %v221_v49, 1326507024  ;;  %v226_v2 = vsel %vm222_vm7, %v206_v59, %v209_v54  ;;  %v228_v60 = vsel %vm224_vm9, %v212_v55, %v227_v51 }
  0xbe   :  { %v233_v4 = vsel %vm223_vm10, %v230_v61, %v232_v53  ;;  %v236_v5 = vsel %vm224_vm9, %v218_v58, %v235_v1  ;;  %v148_v6 = vshrl.u32 %v147_v0, 30  ;;  %v229_v17 = vsel %vm223_vm10, %v226_v2, %v228_v60 }
  0xbf   :  { %v237_v10 = vsel %vm223_vm10, %v234_v63, %v236_v5  ;;  %v2069_v13 = vmul.u32.u64.low %v238_v35, %v233_v4  ;;  %v2070_v14 = vmul.u32.u64.high %v238_v35, %v233_v4, %v2069_v13  ;;  %v245_v22 = vmul.u32 %v238_v35, %v229_v17 }
  0xc0   :  { %v2072_v15 = vmul.u32.u64.low %v238_v35, %v237_v10  ;;  %v2073_v16 = vmul.u32.u64.high %v238_v35, %v237_v10, %v2072_v15  ;;  %v149_v43 = vshll.u32 %v148_v6, 30  ;;  %v142_v42 = vadd.s32 %v2058_v31, %v2055_v29 }
  0xc1   :  { %v248_v19 = vadd.s32 1, %v2070_v14  ;;  %v172_v53 = vsub.s32 4, %v148_v6  ;;  %vm2088_vm1 = vcmp.le.f32.partialorder %v190_v36, 0.7853982  ;;  %vm178_vm5 = vweird.f32 %v2029_v21 }
  0xc2   :  { %v150_v18 = vsub.s32 %v146_v47, %v149_v43  ;;  %vm247_vm11 = vc.u32 %v2073_v16, %v2069_v13  ;;  %v246_v59 = vadd.s32 %v2069_v13, %v2073_v16  ;;  %vm282_vm9 = vweird.f32 %v2037_v30 }
  0xc3   :  { %v249_v25 = vsel %vm247_vm11, %v248_v19, %v2070_v14  ;;  %v173_v10 = vsel %vm88_vm14, %v172_v53, %v148_v6  ;;  %v1714_v53 = vld [vmem:[#allocation5 + $0x44] ss:$16 sps:$4 sm:$0xff]  }
  0xc4   :  { %v152_v24 = vsub.s32 0, %v150_v18  ;;  %v250_v26 = vadd.s32 %v249_v25, %v245_v22  ;;  %v175_v15 = vsel %vm87_vm15, 0, %v173_v10  ;;  %v1721_v10 = vld [vmem:[#allocation5 + $0x220] ss:$16 sps:$4 sm:$0xff]  }
  0xc5   :  { %v179_v17 = vadd.s32 3, %v175_v15  ;;  %v1724_v15 = vld [vmem:[#allocation5] ss:$16 sps:$4 sm:$0xff]  }
  0xc6   :  { %v1523_v27 = vmin.u32 %v152_v24, %v150_v18  ;;  %v251_v32 = vadd.s32 536870912, %v250_v26 }
  0xc7   :  { %v180_v22 = vand.u32 3, %v179_v17  ;;  %v1735_v17 = vld [vmem:[#allocation5 + $0x3e4] ss:$16 sps:$4 sm:$0xff]  }
  0xc8   :  { %v154_v33 = vclz %v1523_v27  ;;  %v252_v34 = vshrl.u32 %v251_v32, 30 }
  0xc9   :  { %vm185_vm2 = vcmp.eq.s32.totalorder %v180_v22, 2  ;;  %vm182_vm3 = vcmp.eq.s32.totalorder %v180_v22, 0  ;;  %vm181_vm4 = vcmp.lt.s32.totalorder %v180_v22, 2  ;;  %v1736_v22 = vld [vmem:[#allocation5 + $0x1c0] ss:$16 sps:$4 sm:$0xff]  }
  0xca   :  { %v1524_v37 = vadd.s32 4294967294, %v154_v33  ;;  %v253_v38 = vshll.u32 %v252_v34, 30 }
  0xcc   :  { %vm1525_vm12 = vcmp.lt.s32.totalorder %v1524_v37, 0  ;;  %v254_v40 = vsub.s32 %v250_v26, %v253_v38 }
  0xcd   :  { %v157_v39 = vsel %vm1525_vm12, 0, %v1524_v37 }
  0xce   :  { %v158_v44 = vsub.s32 32, %v157_v39  ;;  %v162_v35 = vsub.s32 4294967266, %v157_v39  ;;  %v256_v45 = vsub.s32 0, %v254_v40  ;;  %v159_v46 = vshll.u32 %v150_v18, %v157_v39 }
  0xcf   :  { %v276_v18 = vsub.s32 4, %v252_v34 }
  0xd0   :  { %v160_v48 = vshrl.u32 %v142_v42, %v158_v44  ;;  %v163_v50 = vadd.s32 127, %v162_v35  ;;  %v1527_v52 = vmin.u32 %v256_v45, %v254_v40  ;;  %v1682_v42 = vld [vmem:[#allocation5 + $0xe0] ss:$16 sps:$4 sm:$0xff]   ;;  %v1690_v35 = vld [vmem:[#allocation5 + $0xc4] ss:$16 sps:$4 sm:$0xff]  }
  0xd1   :  { %v277_v24 = vsel %vm192_vm0, %v276_v18, %v252_v34  ;;  %v1685_v44 = vld [vmem:[#allocation5 + $0x2e0] ss:$16 sps:$4 sm:$0xff]   ;;  %v1693_v45 = vld [vmem:[#allocation5 + $0x2c4] ss:$16 sps:$4 sm:$0xff]  }
  0xd2   :  { %v161_v54 = vor.u32 %v160_v48, %v159_v46  ;;  %v164_v55 = vshll.u32 %v163_v50, 23  ;;  %v258_v56 = vclz %v1527_v52  ;;  %v279_v33 = vsel %vm2088_vm1, 0, %v277_v24  ;;  %v1691_v50 = vld [vmem:[#allocation5 + $0x2c0] ss:$16 sps:$4 sm:$0xff]  }
  0xd3   :  { %v283_v39 = vadd.s32 3, %v279_v33  ;;  %v1730_v18 = vld [vmem:[#allocation5 + $0x1e0] ss:$16 sps:$4 sm:$0xff]   ;;  %v1750_v33 = vld [vmem:[#allocation5 + $0x184] ss:$16 sps:$4 sm:$0xff]  }
  0xd4   :  { %v165_v57 = vor.u32 4788187, %v164_v55  ;;  %v1528_v41 = vadd.s32 4294967294, %v258_v56  ;;  %v168_v47 = vcvt.s32.f32 %v161_v54  ;;  %v1699_v55 = vld [vmem:[#allocation5 + $0x2a4] ss:$16 sps:$4 sm:$0xff]  }
  0xd5   :  { %v284_v46 = vand.u32 3, %v283_v39  ;;  %v1739_v24 = vld [vmem:[#allocation5 + $0x3c0] ss:$16 sps:$4 sm:$0xff]   ;;  %v1756_v39 = vld [vmem:[#allocation5 + $0x164] ss:$16 sps:$4 sm:$0xff]  }
  0xd6   :  { %v166_v58 = vand.u32 2147483647, %v165_v57  ;;  %vm1529_vm13 = vcmp.lt.s32.totalorder %v1528_v41, 0 }
  0xd7   :  { %v261_v51 = vsel %vm1529_vm13, 0, %v1528_v41  ;;  %vm289_vm6 = vcmp.eq.s32.totalorder %v284_v46, 2  ;;  %vm286_vm7 = vcmp.eq.s32.totalorder %v284_v46, 0  ;;  %vm285_vm8 = vcmp.lt.s32.totalorder %v284_v46, 2  ;;  %v1763_v46 = vld [vmem:[#allocation5 + $0x340] ss:$16 sps:$4 sm:$0xff]  }
  0xd8   :  { %v169_v49 = vmul.f32 %v168_v47, %v166_v58  ;;  %v262_v29 = vsub.s32 32, %v261_v51  ;;  %v266_v31 = vsub.s32 4294967266, %v261_v51  ;;  %v263_v62 = vshll.u32 %v254_v40, %v261_v51  ;;  %v1697_v58 = vld [vmem:[#allocation5 + $0x2a0] ss:$16 sps:$4 sm:$0xff]   ;;  %v1702_v51 = vld [vmem:[#allocation5 + $0x84] ss:$16 sps:$4 sm:$0xff]  }
  0xda   :  { %v170_v61 = vxor.u32 2147483648, %v169_v49  ;;  %v264_v63 = vshrl.u32 %v246_v59, %v262_v29  ;;  %v267_v0 = vadd.s32 127, %v266_v31  ;;  %v1705_v59 = vld [vmem:[#allocation5 + $0x284] ss:$16 sps:$4 sm:$0xff]   ;;  %v1700_v31 = vld [vmem:[#allocation5 + $0x80] ss:$16 sps:$4 sm:$0xff]  }
  0xdc   :  { %v171_v1 = vsel %vm88_vm14, %v170_v61, %v169_v49  ;;  %v265_v2 = vor.u32 %v264_v63, %v263_v62  ;;  %v268_v60 = vshll.u32 %v267_v0, 23  ;;  %v1703_v61 = vld [vmem:[#allocation5 + $0x280] ss:$16 sps:$4 sm:$0xff]   ;;  %v1708_v62 = vld [vmem:[#allocation5 + $0x64] ss:$16 sps:$4 sm:$0xff]  }
  0xdd   :  { %v174_v4 = vsel %vm87_vm15, %v2029_v21, %v171_v1  ;;  %v1688_v21 = vld [vmem:[#allocation5 + $0xc0] ss:$16 sps:$4 sm:$0xff]   ;;  %v1711_v63 = vld [vmem:[#allocation5 + $0x264] ss:$16 sps:$4 sm:$0xff]  }
  0xde   :  { %1874 = vcosq.f32 %v174_v4  ;;  %v269_v5 = vor.u32 4788187, %v268_v60  ;;  %v272_v14 = vcvt.s32.f32 %v265_v2  ;;  %v1709_v0 = vld [vmem:[#allocation5 + $0x260] ss:$16 sps:$4 sm:$0xff]   ;;  %v1717_v1 = vld [vmem:[#allocation5 + $0x244] ss:$16 sps:$4 sm:$0xff]  }
  0xdf   :  { %1876 = vsinq.f32 %v174_v4  ;;  %v1715_v2 = vld [vmem:[#allocation5 + $0x240] ss:$16 sps:$4 sm:$0xff]   ;;  %v1720_v60 = vld [vmem:[#allocation5 + $0x24] ss:$16 sps:$4 sm:$0xff]  }
  0xe0   :  { %v270_v13 = vand.u32 2147483647, %v269_v5  ;;  %v1723_v4 = vld [vmem:[#allocation5 + $0x224] ss:$16 sps:$4 sm:$0xff]   ;;  %v1718_v5 = vld [vmem:[#allocation5 + $0x20] ss:$16 sps:$4 sm:$0xff]  }
  0xe2   :  { %v273_v16 = vmul.f32 %v272_v14, %v270_v13  ;;  %v1726_v13 = vld [vmem:[#allocation5 + $0x4] ss:$16 sps:$4 sm:$0xff]  }
  0xe3   :  { %v1729_v14 = vld [vmem:[#allocation5 + $0x204] ss:$16 sps:$4 sm:$0xff]  }
  0xe4   :  { %v274_v43 = vxor.u32 2147483648, %v273_v16 }
  0xe6   :  { %v275_v19 = vsel %vm192_vm0, %v274_v43, %v273_v16  ;;  %v1727_v16 = vld [vmem:[#allocation5 + $0x200] ss:$16 sps:$4 sm:$0xff]   ;;  %v1732_v43 = vld [vmem:[#allocation5 + $0x1e4] ss:$16 sps:$4 sm:$0xff]  }
  0xe7   :  { %v278_v6 = vsel %vm2088_vm1, %v2037_v30, %v275_v19  ;;  %v1706_v30 = vld [vmem:[#allocation5 + $0x60] ss:$16 sps:$4 sm:$0xff]  }
  0xe8   :  { %1878 = vcosq.f32 %v278_v6  ;;  %v1733_v19 = vld [vmem:[#allocation5 + $0x3e0] ss:$16 sps:$4 sm:$0xff]  }
  0xe9   :  { %1880 = vsinq.f32 %v278_v6  ;;  %v1741_v6 = vld [vmem:[#allocation5 + $0x3c4] ss:$16 sps:$4 sm:$0xff]  }
  0xeb   :  { %v1875_v25 = vpop.eup %1874 }
  0xec   :  { %v1877_v26 = vpop.eup %1876  ;;  %v186_v27 = vxor.u32 2147483648, %v1875_v25 }
  0xed   :  { %v183_v32 = vxor.u32 2147483648, %v1877_v26 }
  0xee   :  { %v187_v36 = vsel %vm185_vm2, %v186_v27, %v1877_v26  ;;  %v1747_v26 = vld [vmem:[#allocation5 + $0x3a4] ss:$16 sps:$4 sm:$0xff]   ;;  %v1742_v27 = vld [vmem:[#allocation5 + $0x1a0] ss:$16 sps:$4 sm:$0xff]  }
  0xef   :  { %v184_v37 = vsel %vm182_vm3, %v1875_v25, %v183_v32  ;;  %v1744_v25 = vld [vmem:[#allocation5 + $0x1a4] ss:$16 sps:$4 sm:$0xff]   ;;  %v1745_v32 = vld [vmem:[#allocation5 + $0x3a0] ss:$16 sps:$4 sm:$0xff]  }
  0xf0   :  { %v188_v38 = vsel %vm181_vm4, %v184_v37, %v187_v36  ;;  %v1753_v36 = vld [vmem:[#allocation5 + $0x384] ss:$16 sps:$4 sm:$0xff]   ;;  %v1748_v37 = vld [vmem:[#allocation5 + $0x180] ss:$16 sps:$4 sm:$0xff]  }
  0xf1   :  { %v189_v40 = vsel %vm178_vm5, nan, %v188_v38  ;;  %v1751_v38 = vld [vmem:[#allocation5 + $0x380] ss:$16 sps:$4 sm:$0xff]  }
  0xf2   :  { %v294_v34 = vadd.f32 %v189_v40, %v2027_v20  ;;  %v1696_v20 = vld [vmem:[#allocation5 + $0xa4] ss:$16 sps:$4 sm:$0xff]  }
  0xf3   :  { %v1759_v40 = vld [vmem:[#allocation5 + $0x364] ss:$16 sps:$4 sm:$0xff]  }
  0xf4   :  { %425 = vmatmul.mubr.f32.vlgmr.msra.gmra.mxu0 %v294_v34  ;;  %502 = vmatmul.mubr.f32.vlgmr.msra.gmra.mxu1 %v294_v34  ;;  %v1754_v34 = vld [vmem:[#allocation5 + $0x160] ss:$16 sps:$4 sm:$0xff]  }
  0xf5   :  { %430 = vmatprep.mubr.f32.mxu0 %v1955_v3  ;;  %507 = vmatprep.mubr.f32.mxu1 %v1955_v3  ;;  %v1879_v48 = vpop.eup %1878  ;;  %v1694_v3 = vld [vmem:[#allocation5 + $0xa0] ss:$16 sps:$4 sm:$0xff]  }
  0xf6   :  { %1317 = vmatpush1.bf16.msra.mxu0 %v1682_v42  ;;  %1360 = vmatpush1.bf16.msra.mxu1 %v1685_v44  ;;  %v1881_v52 = vpop.eup %1880  ;;  %v290_v54 = vxor.u32 2147483648, %v1879_v48  ;;  %v1757_v42 = vld [vmem:[#allocation5 + $0x360] ss:$16 sps:$4 sm:$0xff]   ;;  %v1762_v44 = vld [vmem:[#allocation5 + $0x144] ss:$16 sps:$4 sm:$0xff]  }
  0xf7   :  { %1318 = vmatprep.subr.bf16.mxu0 %v1690_v35  ;;  %1361 = vmatprep.subr.bf16.mxu1 %v1693_v45  ;;  %v287_v56 = vxor.u32 2147483648, %v1881_v52  ;;  %v1765_v35 = vld [vmem:[#allocation5 + $0x344] ss:$16 sps:$4 sm:$0xff]   ;;  %v1760_v45 = vld [vmem:[#allocation5 + $0x140] ss:$16 sps:$4 sm:$0xff]  }
  0xf8   :  { %v291_v57 = vsel %vm289_vm6, %v290_v54, %v1881_v52  ;;  %v1771_v52 = vld [vmem:[#allocation5 + $0x324] ss:$16 sps:$4 sm:$0xff]  }
  0xf9   :  { %v288_v41 = vsel %vm286_vm7, %v1879_v48, %v287_v56  ;;  %v1766_v48 = vld [vmem:[#allocation5 + $0x120] ss:$16 sps:$4 sm:$0xff]   ;;  %v1774_v54 = vld [vmem:[#allocation5 + $0x104] ss:$16 sps:$4 sm:$0xff]  }
  0xfa   :  { %1319 = vmatpush1.bf16.msra.mxu0 %v1688_v21  ;;  %1362 = vmatpush1.bf16.msra.mxu1 %v1691_v50  ;;  %v292_v47 = vsel %vm285_vm8, %v288_v41, %v291_v57  ;;  %v1768_v21 = vld [vmem:[#allocation5 + $0x124] ss:$16 sps:$4 sm:$0xff]   ;;  %v1769_v50 = vld [vmem:[#allocation5 + $0x320] ss:$16 sps:$4 sm:$0xff]   ;;  %v1780_v57 = vld [vmem:[#allocation5 + $0xec] ss:$16 sps:$4 sm:$0xff]  }
  0xfb   :  { %1320 = vmatprep.subr.bf16.mxu0 %v1696_v20  ;;  %1363 = vmatprep.subr.bf16.mxu1 %v1699_v55  ;;  %v293_v49 = vsel %vm282_vm9, nan, %v292_v47  ;;  %v1777_v20 = vld [vmem:[#allocation5 + $0x304] ss:$16 sps:$4 sm:$0xff]   ;;  %v1772_v55 = vld [vmem:[#allocation5 + $0x100] ss:$16 sps:$4 sm:$0xff]  }
  0xfc   :  { %v295_v29 = vadd.f32 %v293_v49, %v2033_v28  ;;  %v1712_v28 = vld [vmem:[#allocation5 + $0x40] ss:$16 sps:$4 sm:$0xff]   ;;  %v1783_v41 = vld [vmem:[#allocation5 + $0x2ec] ss:$16 sps:$4 sm:$0xff]  }
  0xfd   :  { %v1775_v56 = vld [vmem:[#allocation5 + $0x300] ss:$16 sps:$4 sm:$0xff]  }
  0xfe   :  { %1321 = vmatpush1.bf16.msra.mxu0 %v1694_v3  ;;  %1364 = vmatpush1.bf16.msra.mxu1 %v1697_v58 }
  0xff   :  { %431 = vmatmul.mubr.f32.gmra.mxu0 %v295_v29  ;;  %508 = vmatmul.mubr.f32.gmra.mxu1 %v295_v29 }
 0x100   :  { %1322 = vmatprep.subr.bf16.mxu0 %v1702_v51  ;;  %1365 = vmatprep.subr.bf16.mxu1 %v1705_v59 }
 0x102   :  { %1323 = vmatpush1.bf16.msra.mxu0 %v1700_v31  ;;  %1366 = vmatpush1.bf16.msra.mxu1 %v1703_v61 }
 0x103   :  { %1324 = vmatprep.subr.bf16.mxu0 %v1708_v62  ;;  %1367 = vmatprep.subr.bf16.mxu1 %v1711_v63 }
 0x106   :  { %1325 = vmatpush1.bf16.msra.mxu0 %v1706_v30  ;;  %1368 = vmatpush1.bf16.msra.mxu1 %v1709_v0 }
 0x107   :  { %1326 = vmatprep.subr.bf16.mxu0 %v1714_v53  ;;  %1369 = vmatprep.subr.bf16.mxu1 %v1717_v1 }
 0x10a   :  { %1327 = vmatpush1.bf16.msra.mxu0 %v1712_v28  ;;  %1370 = vmatpush1.bf16.msra.mxu1 %v1715_v2 }
 0x10b   :  { %1328 = vmatprep.subr.bf16.mxu0 %v1720_v60  ;;  %1371 = vmatprep.subr.bf16.mxu1 %v1723_v4  ;;  %v1778_v4 = vld [vmem:[#allocation5 + $0xe8] ss:$16 sps:$4 sm:$0xff]  }
 0x10e   :  { %1329 = vmatpush1.bf16.msra.mxu0 %v1718_v5  ;;  %1372 = vmatpush1.bf16.msra.mxu1 %v1721_v10  ;;  %v1781_v5 = vld [vmem:[#allocation5 + $0x2e8] ss:$16 sps:$4 sm:$0xff]  }
 0x10f   :  { %1330 = vmatprep.subr.bf16.mxu0 %v1726_v13  ;;  %1373 = vmatprep.subr.bf16.mxu1 %v1729_v14  ;;  %v1786_v14 = vld [vmem:[#allocation5 + $0xcc] ss:$16 sps:$4 sm:$0xff]  }
 0x112   :  { %1331 = vmatpush1.bf16.msra.mxu0 %v1724_v15  ;;  %1374 = vmatpush1.bf16.msra.mxu1 %v1727_v16  ;;  %v1789_v15 = vld [vmem:[#allocation5 + $0x2cc] ss:$16 sps:$4 sm:$0xff]   ;;  %v1784_v16 = vld [vmem:[#allocation5 + $0xc8] ss:$16 sps:$4 sm:$0xff]  }
 0x113   :  { %1332 = vmatprep.subr.bf16.mxu0 %v1732_v43  ;;  %1375 = vmatprep.subr.bf16.mxu1 %v1735_v17  ;;  %v1787_v43 = vld [vmem:[#allocation5 + $0x2c8] ss:$16 sps:$4 sm:$0xff]   ;;  %v1792_v17 = vld [vmem:[#allocation5 + $0xac] ss:$16 sps:$4 sm:$0xff]  }
 0x116   :  { %1333 = vmatpush2.bf16.msra.mxu0 %v1730_v18  ;;  %1376 = vmatpush2.bf16.msra.mxu1 %v1733_v19  ;;  %v1795_v18 = vld [vmem:[#allocation5 + $0x2ac] ss:$16 sps:$4 sm:$0xff]   ;;  %v1790_v19 = vld [vmem:[#allocation5 + $0xa8] ss:$16 sps:$4 sm:$0xff]  }
 0x117   :  { %1334 = vmatprep.subr.bf16.mxu0 %v1738_v23  ;;  %1377 = vmatprep.subr.bf16.mxu1 %v1741_v6  ;;  %v1793_v23 = vld [vmem:[#allocation5 + $0x2a8] ss:$16 sps:$4 sm:$0xff]   ;;  %v1798_v6 = vld [vmem:[#allocation5 + $0x8c] ss:$16 sps:$4 sm:$0xff]  }
 0x11a   :  { %1335 = vmatpush2.bf16.msra.mxu0 %v1736_v22  ;;  %1378 = vmatpush2.bf16.msra.mxu1 %v1739_v24  ;;  %v1801_v22 = vld [vmem:[#allocation5 + $0x28c] ss:$16 sps:$4 sm:$0xff]   ;;  %v1796_v24 = vld [vmem:[#allocation5 + $0x88] ss:$16 sps:$4 sm:$0xff]  }
 0x11b   :  { %1336 = vmatprep.subr.bf16.mxu0 %v1744_v25  ;;  %1379 = vmatprep.subr.bf16.mxu1 %v1747_v26  ;;  %v1799_v25 = vld [vmem:[#allocation5 + $0x288] ss:$16 sps:$4 sm:$0xff]   ;;  %v1804_v26 = vld [vmem:[#allocation5 + $0x6c] ss:$16 sps:$4 sm:$0xff]  }
 0x11e   :  { %1337 = vmatpush2.bf16.msra.mxu0 %v1742_v27  ;;  %1380 = vmatpush2.bf16.msra.mxu1 %v1745_v32  ;;  %v1807_v27 = vld [vmem:[#allocation5 + $0x26c] ss:$16 sps:$4 sm:$0xff]   ;;  %v1802_v32 = vld [vmem:[#allocation5 + $0x68] ss:$16 sps:$4 sm:$0xff]  }
 0x11f   :  { %1338 = vmatprep.subr.bf16.mxu0 %v1750_v33  ;;  %1381 = vmatprep.subr.bf16.mxu1 %v1753_v36  ;;  %v1805_v33 = vld [vmem:[#allocation5 + $0x268] ss:$16 sps:$4 sm:$0xff]   ;;  %v1810_v36 = vld [vmem:[#allocation5 + $0x4c] ss:$16 sps:$4 sm:$0xff]  }
 0x122   :  { %1339 = vmatpush2.bf16.msra.mxu0 %v1748_v37  ;;  %1382 = vmatpush2.bf16.msra.mxu1 %v1751_v38  ;;  %v1813_v37 = vld [vmem:[#allocation5 + $0x24c] ss:$16 sps:$4 sm:$0xff]   ;;  %v1808_v38 = vld [vmem:[#allocation5 + $0x48] ss:$16 sps:$4 sm:$0xff]  }
 0x123   :  { %1340 = vmatprep.subr.bf16.mxu0 %v1756_v39  ;;  %1383 = vmatprep.subr.bf16.mxu1 %v1759_v40  ;;  %v1811_v39 = vld [vmem:[#allocation5 + $0x248] ss:$16 sps:$4 sm:$0xff]   ;;  %v1816_v40 = vld [vmem:[#allocation5 + $0x2c] ss:$16 sps:$4 sm:$0xff]  }
 0x126   :  { %1341 = vmatpush2.bf16.msra.mxu0 %v1754_v34  ;;  %1384 = vmatpush2.bf16.msra.mxu1 %v1757_v42  ;;  %v1819_v34 = vld [vmem:[#allocation5 + $0x22c] ss:$16 sps:$4 sm:$0xff]   ;;  %v1814_v42 = vld [vmem:[#allocation5 + $0x28] ss:$16 sps:$4 sm:$0xff]  }
 0x127   :  { %1342 = vmatprep.subr.bf16.mxu0 %v1762_v44  ;;  %1385 = vmatprep.subr.bf16.mxu1 %v1765_v35  ;;  %v1817_v44 = vld [vmem:[#allocation5 + $0x228] ss:$16 sps:$4 sm:$0xff]   ;;  %v1822_v35 = vld [vmem:[#allocation5 + $0xc] ss:$16 sps:$4 sm:$0xff]  }
 0x12a   :  { %1343 = vmatpush2.bf16.msra.mxu0 %v1760_v45  ;;  %1386 = vmatpush2.bf16.msra.mxu1 %v1763_v46  ;;  %v1825_v45 = vld [vmem:[#allocation5 + $0x20c] ss:$16 sps:$4 sm:$0xff]   ;;  %v1820_v46 = vld [vmem:[#allocation5 + $0x8] ss:$16 sps:$4 sm:$0xff]  }
 0x12b   :  { %1344 = vmatprep.subr.bf16.mxu0 %v1768_v21  ;;  %1387 = vmatprep.subr.bf16.mxu1 %v1771_v52  ;;  %v1828_v21 = vld [vmem:[#allocation5 + $0x1ec] ss:$16 sps:$4 sm:$0xff]   ;;  %v1826_v52 = vld [vmem:[#allocation5 + $0x1e8] ss:$16 sps:$4 sm:$0xff]  }
 0x12e   :  { %1345 = vmatpush2.bf16.msra.mxu0 %v1766_v48  ;;  %1388 = vmatpush2.bf16.msra.mxu1 %v1769_v50  ;;  %v1823_v48 = vld [vmem:[#allocation5 + $0x208] ss:$16 sps:$4 sm:$0xff]   ;;  %v1831_v50 = vld [vmem:[#allocation5 + $0x3ec] ss:$16 sps:$4 sm:$0xff]  }
 0x12f   :  { %1346 = vmatprep.subr.bf16.mxu0 %v1774_v54  ;;  %1389 = vmatprep.subr.bf16.mxu1 %v1777_v20  ;;  %v1829_v54 = vld [vmem:[#allocation5 + $0x3e8] ss:$16 sps:$4 sm:$0xff]   ;;  %v1834_v20 = vld [vmem:[#allocation5 + $0x1cc] ss:$16 sps:$4 sm:$0xff]  }
 0x132   :  { %1347 = vmatpush2.bf16.msra.mxu0 %v1772_v55  ;;  %1390 = vmatpush2.bf16.msra.mxu1 %v1775_v56  ;;  %v1837_v55 = vld [vmem:[#allocation5 + $0x3cc] ss:$16 sps:$4 sm:$0xff]   ;;  %v1832_v56 = vld [vmem:[#allocation5 + $0x1c8] ss:$16 sps:$4 sm:$0xff]  }
 0x133   :  { %1402 = vmatprep.subr.bf16.mxu0 %v1780_v57  ;;  %1445 = vmatprep.subr.bf16.mxu1 %v1783_v41  ;;  %v1835_v57 = vld [vmem:[#allocation5 + $0x3c8] ss:$16 sps:$4 sm:$0xff]   ;;  %v1840_v41 = vld [vmem:[#allocation5 + $0x1ac] ss:$16 sps:$4 sm:$0xff]  }
 0x1b4   :  { %v426_v3 = vpop.f32.mrf.mxu0  ;;  %v503_v58 = vpop.f32.mrf.mxu1 }
 0x1b5   :  { %v514_v1 = vmax.f32 %v426_v3, 0.0  ;;  %v516_v28 = vmax.f32 %v503_v58, 0.0  ;;  %v1843_v3 = vld [vmem:[#allocation5 + $0x3ac] ss:$16 sps:$4 sm:$0xff]   ;;  %v1838_v58 = vld [vmem:[#allocation5 + $0x1a8] ss:$16 sps:$4 sm:$0xff]  }
 0x1b6   :  { %v428_v47 = vpop.f32.mrf.mxu0  ;;  %v505_v49 = vpop.f32.mrf.mxu1 }
 0x1b7   :  { %v515_v63 = vmax.f32 %v428_v47, 0.0  ;;  %v517_v30 = vmax.f32 %v505_v49, 0.0  ;;  %v1841_v47 = vld [vmem:[#allocation5 + $0x3a8] ss:$16 sps:$4 sm:$0xff]   ;;  %v1846_v49 = vld [vmem:[#allocation5 + $0x18c] ss:$16 sps:$4 sm:$0xff]  }
 0x1bf   :  { %v432_v51 = vpop.f32.mrf.mxu0  ;;  %v509_v59 = vpop.f32.mrf.mxu1 }
 0x1c0   :  { %v518_v29 = vmax.f32 %v432_v51, 0.0  ;;  %v520_v31 = vmax.f32 %v509_v59, 0.0  ;;  %v1849_v51 = vld [vmem:[#allocation5 + $0x38c] ss:$16 sps:$4 sm:$0xff]   ;;  %v1844_v59 = vld [vmem:[#allocation5 + $0x188] ss:$16 sps:$4 sm:$0xff]  }
 0x1c1   :  { %v434_v61 = vpop.f32.mrf.mxu0  ;;  %v511_v62 = vpop.f32.mrf.mxu1 }
 0x1c2   :  { %v519_v0 = vmax.f32 %v434_v61, 0.0  ;;  %v521_v53 = vmax.f32 %v511_v62, 0.0  ;;  %v2103_v10 = vpack.c.bf16 %v518_v29, %v514_v1  ;;  %v2105_v13 = vpack.c.bf16 %v520_v31, %v516_v28  ;;  %v1847_v29 = vld [vmem:[#allocation5 + $0x388] ss:$16 sps:$4 sm:$0xff]   ;;  %v1852_v31 = vld [vmem:[#allocation5 + $0x16c] ss:$16 sps:$4 sm:$0xff]  }
 0x1c3   :  { %v1855_v61 = vld [vmem:[#allocation5 + $0x36c] ss:$16 sps:$4 sm:$0xff]   ;;  %v1850_v62 = vld [vmem:[#allocation5 + $0x168] ss:$16 sps:$4 sm:$0xff]  }
 0x1c4   :  { %v523_v2 = vpack.c.bf16 %v519_v0, %v515_v63  ;;  %v525_v60 = vpack.c.bf16 %v521_v53, %v517_v30  ;;  %v1853_v63 = vld [vmem:[#allocation5 + $0x368] ss:$16 sps:$4 sm:$0xff]   ;;  %v1858_v30 = vld [vmem:[#allocation5 + $0x14c] ss:$16 sps:$4 sm:$0xff]  }
 0x1c5   :  { %v1861_v0 = vld [vmem:[#allocation5 + $0x34c] ss:$16 sps:$4 sm:$0xff]   ;;  %v1856_v53 = vld [vmem:[#allocation5 + $0x148] ss:$16 sps:$4 sm:$0xff]  }
 0x1c6   :  { %1348 = vmatprep.mubr.bf16.mxu0 %v523_v2  ;;  %1391 = vmatprep.mubr.bf16.mxu1 %v525_v60  ;;  %v1859_v1 = vld [vmem:[#allocation5 + $0x348] ss:$16 sps:$4 sm:$0xff]   ;;  %v1864_v28 = vld [vmem:[#allocation5 + $0x12c] ss:$16 sps:$4 sm:$0xff]  }
 0x1c7   :  { %1349 = vmatmul.mubr.bf16.vlgmr.msra.gmra.mxu0 %v2103_v10  ;;  %1392 = vmatmul.mubr.bf16.vlgmr.msra.gmra.mxu1 %v2105_v13 }
 0x1c8   :  { %1403 = vmatpush1.bf16.msra.mxu0 %v1778_v4  ;;  %1446 = vmatpush1.bf16.msra.mxu1 %v1781_v5  ;;  %v1865_v4 = vld [vmem:[#allocation5 + $0x328] ss:$16 sps:$4 sm:$0xff]   ;;  %v1870_v5 = vld [vmem:[#allocation5 + $0x10c] ss:$16 sps:$4 sm:$0xff]  }
 0x1c9   :  { %1434 = vmatprep.mubr.bf16.mxu0 %v523_v2  ;;  %1477 = vmatprep.mubr.bf16.mxu1 %v525_v60  ;;  %v1867_v2 = vld [vmem:[#allocation5 + $0x32c] ss:$16 sps:$4 sm:$0xff]   ;;  %v1862_v60 = vld [vmem:[#allocation5 + $0x128] ss:$16 sps:$4 sm:$0xff]  }
 0x1ca   :  { %1404 = vmatprep.subr.bf16.mxu0 %v1786_v14  ;;  %1447 = vmatprep.subr.bf16.mxu1 %v1789_v15  ;;  %v1873_v14 = vld [vmem:[#allocation5 + $0x30c] ss:$16 sps:$4 sm:$0xff]   ;;  %v1868_v15 = vld [vmem:[#allocation5 + $0x108] ss:$16 sps:$4 sm:$0xff]  }
 0x1cc   :  { %1405 = vmatpush1.bf16.msra.mxu0 %v1784_v16  ;;  %1448 = vmatpush1.bf16.msra.mxu1 %v1787_v43  ;;  %v1871_v16 = vld [vmem:[#allocation5 + $0x308] ss:$16 sps:$4 sm:$0xff]   ;;  %v654_v43 = vld [vmem:[%s2132_s4] sm:$0xf]  ;;  %s1962_s4 = smov [#allocation7]  }
 0x1cd   :  { %1406 = vmatprep.subr.bf16.mxu0 %v1792_v17  ;;  %1449 = vmatprep.subr.bf16.mxu1 %v1795_v18  ;;  %v659_v17 = vrot.slane %v654_v43, %v76_v9  ;;  %v663_v18 = vrot.slane %v654_v43, %v82_v12  ;;  %s1509_s11 = sshll.u32 %s1962_s4, 4  ;;  %s1510_s11 = int_to_ptr.vmem [resolvable:$true] %s1509_s11 }
 0x1ce   :  { %s1922_s12 = scalar_lea.vmem %s1510_s11, 1024  ;;  %p1927_p11 = scmp.lt.s32.totalorder %s1510_s11, %s1510_s11 }
 0x1cf   :  { %p1923_p10 = scmp.ne.s32.totalorder %s1510_s11, %s1922_s12  ;;  %p1928_p12 = scmp.lt.s32.totalorder %s1922_s12, %s1922_s12 }
 0x1d0   :  { %1407 = vmatpush1.bf16.msra.mxu0 %v1790_v19  ;;  %1450 = vmatpush1.bf16.msra.mxu1 %v1793_v23 }
 0x1d1   :  { %1408 = vmatprep.subr.bf16.mxu0 %v1798_v6  ;;  %1451 = vmatprep.subr.bf16.mxu1 %v1801_v22  ;;  %p1929_p13 = por %p1928_p12, %p1927_p11 }
 0x1d3   :  { %p1930_p0 = pnand %p1929_p13, %p1923_p10 }
 0x1d4   :  { %1409 = vmatpush1.bf16.msra.mxu0 %v1796_v24  ;;  %1452 = vmatpush1.bf16.msra.mxu1 %v1799_v25 }
 0x1d5   :  { %1410 = vmatprep.subr.bf16.mxu0 %v1804_v26  ;;  %1453 = vmatprep.subr.bf16.mxu1 %v1807_v27 }
 0x1d8   :  { %1411 = vmatpush1.bf16.msra.mxu0 %v1802_v32  ;;  %1454 = vmatpush1.bf16.msra.mxu1 %v1805_v33 }
 0x1d9   :  { %1412 = vmatprep.subr.bf16.mxu0 %v1810_v36  ;;  %1455 = vmatprep.subr.bf16.mxu1 %v1813_v37 }
 0x1dc   :  { %1413 = vmatpush1.bf16.msra.mxu0 %v1808_v38  ;;  %1456 = vmatpush1.bf16.msra.mxu1 %v1811_v39 }
 0x1dd   :  { %1414 = vmatprep.subr.bf16.mxu0 %v1816_v40  ;;  %1457 = vmatprep.subr.bf16.mxu1 %v1819_v34 }
 0x1e0   :  { %1415 = vmatpush1.bf16.msra.mxu0 %v1814_v42  ;;  %1458 = vmatpush1.bf16.msra.mxu1 %v1817_v44  ;;  %v667_v42 = vrot.slane %v654_v43, %v54_v8  ;;  %v671_v44 = vrot.slane %v654_v43, %v70_v11 }
 0x1e1   :  { %1416 = vmatprep.subr.bf16.mxu0 %v1822_v35  ;;  %1459 = vmatprep.subr.bf16.mxu1 %v1825_v45 }
 0x1e4   :  { %1417 = vmatpush1.bf16.msra.mxu0 %v1820_v46  ;;  %1460 = vmatpush1.bf16.msra.mxu1 %v1823_v48 }
 0x1e5   :  { %1418 = vmatprep.subr.bf16.mxu0 %v1828_v21  ;;  %1461 = vmatprep.subr.bf16.mxu1 %v1831_v50 }
 0x1e8   :  { %1419 = vmatpush2.bf16.msra.mxu0 %v1826_v52  ;;  %1462 = vmatpush2.bf16.msra.mxu1 %v1829_v54 }
 0x1e9   :  { %1420 = vmatprep.subr.bf16.mxu0 %v1834_v20  ;;  %1463 = vmatprep.subr.bf16.mxu1 %v1837_v55 }
 0x1ec   :  { %1421 = vmatpush2.bf16.msra.mxu0 %v1832_v56  ;;  %1464 = vmatpush2.bf16.msra.mxu1 %v1835_v57 }
 0x1ed   :  { %1422 = vmatprep.subr.bf16.mxu0 %v1840_v41  ;;  %1465 = vmatprep.subr.bf16.mxu1 %v1843_v3 }
 0x1f0   :  { %1423 = vmatpush2.bf16.msra.mxu0 %v1838_v58  ;;  %1466 = vmatpush2.bf16.msra.mxu1 %v1841_v47 }
 0x1f1   :  { %1424 = vmatprep.subr.bf16.mxu0 %v1846_v49  ;;  %1467 = vmatprep.subr.bf16.mxu1 %v1849_v51 }
 0x1f4   :  { %1425 = vmatpush2.bf16.msra.mxu0 %v1844_v59  ;;  %1468 = vmatpush2.bf16.msra.mxu1 %v1847_v29 }
 0x1f5   :  { %1426 = vmatprep.subr.bf16.mxu0 %v1852_v31  ;;  %1469 = vmatprep.subr.bf16.mxu1 %v1855_v61 }
 0x1f8   :  { %1427 = vmatpush2.bf16.msra.mxu0 %v1850_v62  ;;  %1470 = vmatpush2.bf16.msra.mxu1 %v1853_v63 }
 0x1f9   :  { %1428 = vmatprep.subr.bf16.mxu0 %v1858_v30  ;;  %1471 = vmatprep.subr.bf16.mxu1 %v1861_v0 }
 0x1fc   :  { %1429 = vmatpush2.bf16.msra.mxu0 %v1856_v53  ;;  %1472 = vmatpush2.bf16.msra.mxu1 %v1859_v1 }
 0x1fd   :  { %1430 = vmatprep.subr.bf16.mxu0 %v1864_v28  ;;  %1473 = vmatprep.subr.bf16.mxu1 %v1867_v2 }
 0x200   :  { %1431 = vmatpush2.bf16.msra.mxu0 %v1862_v60  ;;  %1474 = vmatpush2.bf16.msra.mxu1 %v1865_v4 }
 0x201   :  { %1432 = vmatprep.subr.bf16.mxu0 %v1870_v5  ;;  %1475 = vmatprep.subr.bf16.mxu1 %v1873_v14 }
 0x204   :  { %1433 = vmatpush2.bf16.msra.mxu0 %v1868_v15  ;;  %1476 = vmatpush2.bf16.msra.mxu1 %v1871_v16 }
 0x207   :  { %1435 = vmatmul.mubr.bf16.vlgmr.msra.gmra.mxu0 %v2103_v10  ;;  %1478 = vmatmul.mubr.bf16.vlgmr.msra.gmra.mxu1 %v2105_v13 }
 0x287   :  { %v1350_v19 = vpop.f32.mrf.mxu0  ;;  %v1393_v23 = vpop.f32.mrf.mxu1 }
 0x288   :  { %v1351_v6 = vadd.f32 %v1350_v19, %v659_v17 }
 0x289   :  { %v1352_v22 = vpop.f32.mrf.mxu0  ;;  %v1395_v24 = vpop.f32.mrf.mxu1 }
 0x28a   :  { %v1394_v25 = vadd.f32 %v1393_v23, %v1351_v6  ;;  %v1353_v26 = vadd.f32 %v1352_v22, %v663_v18 }
 0x28b   :  { %v1354_v10 = vpop.f32.mrf.mxu0  ;;  %v1397_v27 = vpop.f32.mrf.mxu1 }
 0x28c   :  { %v1488_v13 = vmax.f32 %v1394_v25, 0.0  ;;  %v1396_v32 = vadd.f32 %v1395_v24, %v1353_v26  ;;  %v1355_v33 = vadd.f32 %v1354_v10, %v659_v17 }
 0x28d   :  { %v1356_v36 = vpop.f32.mrf.mxu0  ;;  %v1399_v39 = vpop.f32.mrf.mxu1 }
 0x28e   :  { %1496 = vst [vmem:[#allocation7] sm:$0xff] %v1488_v13  ;;  %v1489_v37 = vmax.f32 %v1396_v32, 0.0  ;;  %v1398_v38 = vadd.f32 %v1397_v27, %v1355_v33  ;;  %v1357_v9 = vadd.f32 %v1356_v36, %v663_v18 }
 0x290   :  { %1497 = vst [vmem:[#allocation7 + $0x8] sm:$0xff] %v1489_v37  ;;  %v1492_v12 = vmax.f32 %v1398_v38, 0.0  ;;  %v1400_v40 = vadd.f32 %v1399_v39, %v1357_v9 }
 0x292   :  { %1500 = vst [vmem:[#allocation7 + $0x20] sm:$0xff] %v1492_v12  ;;  %v1493_v34 = vmax.f32 %v1400_v40, 0.0 }
 0x294   :  { %1501 = vst [vmem:[#allocation7 + $0x28] sm:$0xff] %v1493_v34 }
 0x2c7   :  { %v1436_v35 = vpop.f32.mrf.mxu0  ;;  %v1479_v45 = vpop.f32.mrf.mxu1 }
 0x2c8   :  { %v1437_v46 = vadd.f32 %v1436_v35, %v667_v42 }
 0x2c9   :  { %v1438_v48 = vpop.f32.mrf.mxu0  ;;  %v1481_v21 = vpop.f32.mrf.mxu1 }
 0x2ca   :  { %v1480_v50 = vadd.f32 %v1479_v45, %v1437_v46  ;;  %v1439_v52 = vadd.f32 %v1438_v48, %v671_v44 }
 0x2cb   :  { %v1440_v54 = vpop.f32.mrf.mxu0  ;;  %v1483_v20 = vpop.f32.mrf.mxu1 }
 0x2cc   :  { %v1490_v55 = vmax.f32 %v1480_v50, 0.0  ;;  %v1482_v56 = vadd.f32 %v1481_v21, %v1439_v52  ;;  %v1441_v57 = vadd.f32 %v1440_v54, %v667_v42 }
 0x2cd   :  { %v1442_v41 = vpop.f32.mrf.mxu0  ;;  %v1485_v47 = vpop.f32.mrf.mxu1 }
 0x2ce   :  { %1498 = vst [vmem:[#allocation7 + $0x10] sm:$0xff] %v1490_v55  ;;  %v1491_v3 = vmax.f32 %v1482_v56, 0.0  ;;  %v1484_v58 = vadd.f32 %v1483_v20, %v1441_v57  ;;  %v1443_v8 = vadd.f32 %v1442_v41, %v671_v44 }
 0x2d0   :  { %1499 = vst [vmem:[#allocation7 + $0x18] sm:$0xff] %v1491_v3  ;;  %v1494_v7 = vmax.f32 %v1484_v58, 0.0  ;;  %v1486_v11 = vadd.f32 %v1485_v47, %v1443_v8 }
 0x2d2   :  { %1502 = vst [vmem:[#allocation7 + $0x30] sm:$0xff] %v1494_v7  ;;  %v1495_v49 = vmax.f32 %v1486_v11, 0.0 }
 0x2d4   :  { %1503 = vst [vmem:[#allocation7 + $0x38] sm:$0xff] %v1495_v49 }
 0x2d5   :  { %1933 = shalt.err (!%p1930_p0)
}
 0x2d6   :  { %1515 = dma.vmem_to_hbm [thread:$0]  %s1510_s11, 1024, %s2133_s5, [#allocation4], %s1949_s21, %s1949_s21, %s1950_s22  }
 0x2d7   :  { %1946 = dma.done.wait [#allocation4], 1024  }
 0x2d8   :  { %1947 = vsyncadd [#allocation4], 4294966272 }
 0x2d9   :  { %1519 = vsyncpa [#allocation3], 1 }
 0x2da   :  { %1520 = vsyncpa [#allocation6], 1 }
 0x2db   :  { %1521 = vsyncpa [#allocation4], 1 }

</bundles_post_ra>
